<compile_context>
chip_gen: v6e
topology: v6e:2x2x1
jax: 0.10.0
libtpu: 0.0.40
codegen_flags: <defaults>
</compile_context>

<pallas_src>
import functools
import math

import jax
import jax.numpy as jnp
from jax import lax
from jax.experimental import pallas as pl
from jax.experimental.pallas import tpu as pltpu


def _ntxent_kernel(zr_ref, zc_ref, zi_ref, zj_ref, o_ref, acc_ref, *,
                   temperature, eps, pos_scale):
    """One (row_tile, col_tile) grid step of the NT-Xent loss."""
    j = pl.program_id(1)
    inv_sqrt_t = 1.0 / math.sqrt(temperature)
    shift = 1.0 / temperature          # static max of sim (|cos| <= 1)
    shifted_one = math.exp(-shift)     # the "- 1" of the torch denominator, on the shifted scale
    eps2 = eps * eps

    def unit_rows(v):
        # Row-normalize and fold in 1/sqrt(T): a dot of two such rows is cos/T.
        nsq = jnp.sum(v * v, axis=-1, keepdims=True)
        return v * (lax.rsqrt(jnp.maximum(nsq, eps2)) * inv_sqrt_t)

    @pl.when(j == 0)
    def _init():
        acc_ref[...] = jnp.zeros_like(acc_ref)

    zr = unit_rows(zr_ref[...])
    zc = unit_rows(zc_ref[...])

    # (tm, tn) scaled-cosine tile on the MXU; contract the feature dim of BOTH
    # operands -> no transposed copy of the column tile.
    sim = lax.dot_general(zr, zc, (((1,), (1,)), ((), ())),
                          preferred_element_type=jnp.float32)
    # Streaming row-sum of exp(sim - 1/T) (log-sum-exp shift, overflow-safe).
    acc_ref[...] += jnp.sum(jnp.exp(sim - shift), axis=-1, keepdims=True)

    @pl.when(j == pl.num_programs(1) - 1)
    def _finalize():
        # Positive pairs straight from the matching z_i / z_j rows: O(tile * D).
        zi = unit_rows(zi_ref[...])
        zj = unit_rows(zj_ref[...])
        pos = jnp.sum(zi * zj, axis=-1, keepdims=True)          # already / T
        # sum_c exp(sim) - 1 == exp(1/T) * acc - 1  -> log taken stably.
        log_denom = shift + jnp.log(acc_ref[...] - shifted_one)
        tile_loss = jnp.sum(log_denom) - pos_scale * jnp.sum(pos)
        # Lane-dense (8,128) output block; the wrapper reads element [0, 0].
        o_ref[...] = jnp.full(o_ref.shape, tile_loss, dtype=jnp.float32)


def _pick_tile(size, candidates):
    for c in candidates:
        if size % c == 0:
            return c
    return None


def ntxent_loss(z_i, z_j, temperature=0.5, eps=1e-8):
    """Forward pass of the PyTorch NTXentLoss module."""
    b, d = z_i.shape
    n = 2 * b

    # Zero-pad the feature dim to a full 128-lane multiple (does not change
    # dot products or norms) so vregs and the MXU K dim are fully used.
    dp = ((d + 127) // 128) * 128
    zi32 = z_i.astype(jnp.float32)
    zj32 = z_j.astype(jnp.float32)
    if dp != d:
        zi32 = jnp.pad(zi32, ((0, 0), (0, dp - d)))
        zj32 = jnp.pad(zj32, ((0, 0), (0, dp - d)))
    z = jnp.concatenate([zi32, zj32], axis=0)        # (N, Dp)

    # Row tile must divide B (so a tile never straddles the two halves) and be a
    # sublane multiple; otherwise fall back to a single row tile over all N rows.
    cands = (128, 64, 32, 16, 8) if dp >= 2048 else (256, 128, 64, 32, 16, 8)
    tm = _pick_tile(b, cands)
    if tm is None:
        tm = n                                        # whole array as one row tile
        zi_rows, zi_half, pos_scale = b, 1, 2.0       # positives counted once, x2
    else:
        zi_rows, zi_half, pos_scale = tm, b // tm, 1.0
    tn = _pick_tile(n, cands) or n

    grid = (n // tm, n // tn)
    zi_map = (lambda i, j: (0, 0)) if zi_half == 1 else (lambda i, j: (i % zi_half, 0))

    kernel = functools.partial(
        _ntxent_kernel,
        temperature=float(temperature),
        eps=float(eps),
        pos_scale=pos_scale,
    )

    out = pl.pallas_call(
        kernel,
        out_shape=jax.ShapeDtypeStruct((grid[0] * 8, 128), jnp.float32),
        grid_spec=pltpu.PrefetchScalarGridSpec(
            num_scalar_prefetch=0,
            grid=grid,
            in_specs=[
                pl.BlockSpec((tm, dp), lambda i, j: (i, 0)),   # resident row tile of z
                pl.BlockSpec((tn, dp), lambda i, j: (j, 0)),   # streamed column tile of z
                pl.BlockSpec((zi_rows, dp), zi_map),           # z_i rows for positives
                pl.BlockSpec((zi_rows, dp), zi_map),           # z_j rows for positives
            ],
            out_specs=pl.BlockSpec((8, 128), lambda i, j: (i, 0)),
            scratch_shapes=[pltpu.VMEM((tm, 1), jnp.float32)],
        ),
        compiler_params=pltpu.CompilerParams(
            dimension_semantics=("parallel", "arbitrary")),
    )(z, z, zi32, zj32)

    # Tiny final reduction (one scalar per row tile) in plain JAX.
    partials = out[::8, 0]
    return jnp.sum(partials) / n


def _ntxent_loss_ref(z_i, z_j, temperature=0.5, eps=1e-8):
    # Pure-JAX mirror of the PyTorch module (for sanity checking).
    z = jnp.concatenate([z_i, z_j], axis=0).astype(jnp.float32)
    b = z_i.shape[0]
    norm = jnp.sqrt(jnp.sum(z * z, axis=-1, keepdims=True))
    sim = (z @ z.T) / jnp.maximum(norm * norm.T, eps) / temperature
    sim_ij = jnp.diagonal(sim, offset=b)
    sim_ji = jnp.diagonal(sim, offset=-b)
    positive = jnp.concatenate([sim_ij, sim_ji], axis=0)
    denominator = jnp.sum(jnp.exp(sim), axis=-1) - 1.0
    return jnp.mean(jnp.log(denominator) - positive)


if __name__ == "__main__":
    key = jax.random.PRNGKey(0)
    k1, k2, k3, k4 = jax.random.split(key, 4)

    # Small case at the module's natural scale (B=4, D=32) -> single-tile path.
    zi_s = jax.random.normal(k1, (4, 32), dtype=jnp.float32)
    zj_s = jax.random.normal(k2, (4, 32), dtype=jnp.float32)
    out_s = jax.block_until_ready(ntxent_loss(zi_s, zj_s, temperature=0.5))
    ref_s = jax.block_until_ready(_ntxent_loss_ref(zi_s, zj_s, temperature=0.5))
    assert jnp.allclose(out_s, ref_s, rtol=2e-5, atol=2e-5), (out_s, ref_s)

    # Larger case exercising the tiled streaming path (D padding, grid 6x3,
    # multiple row tiles per half, multi-step column reduction).
    zi_l = jax.random.normal(k3, (192, 80), dtype=jnp.float32)
    zj_l = jax.random.normal(k4, (192, 80), dtype=jnp.float32)
    out_l = jax.block_until_ready(ntxent_loss(zi_l, zj_l, temperature=0.5))
    ref_l = jax.block_until_ready(_ntxent_loss_ref(zi_l, zj_l, temperature=0.5))
    assert jnp.allclose(out_l, ref_l, rtol=2e-5, atol=2e-5), (out_l, ref_l)

    print("KERNEL_OK")
</pallas_src>

<mosaic_0001>
module attributes {stable_mosaic.version = 11 : i64} {
  func.func @_ntxent_kernel(%arg0: i32, %arg1: i32, %arg2: memref<8x128xf32, #tpu.memory_space<vmem>>, %arg3: memref<8x128xf32, #tpu.memory_space<vmem>>, %arg4: memref<4x128xf32, #tpu.memory_space<vmem>>, %arg5: memref<4x128xf32, #tpu.memory_space<vmem>>, %arg6: memref<8x128xf32, #tpu.memory_space<vmem>>, %arg7: memref<8x1xf32, #tpu.memory_space<vmem>>) attributes {dimension_semantics = [#tpu.dimension_semantics<parallel>, #tpu.dimension_semantics<arbitrary>], iteration_bounds = array<i64: 1, 1>, scalar_prefetch = 0 : i64, scratch_operands = 1 : i64, tpu.core_type = #tpu.core_type<tc>, window_params = [{transform_indices = @transform_0, window_bounds = array<i64: 8, 128>}, {transform_indices = @transform_1, window_bounds = array<i64: 8, 128>}, {pipeline_mode = #tpu.pipeline_mode<synchronous>, transform_indices = @transform_2, window_bounds = array<i64: 4, 128>}, {pipeline_mode = #tpu.pipeline_mode<synchronous>, transform_indices = @transform_3, window_bounds = array<i64: 4, 128>}, {transform_indices = @transform_4, window_bounds = array<i64: 8, 128>}]} {
    %c0_i32 = arith.constant 0 : i32
    %0 = arith.cmpi eq, %arg1, %c0_i32 : i32
    %1 = arith.extui %0 : i1 to i32
    %c0_i32_0 = arith.constant 0 : i32
    %2 = arith.cmpi ne, %1, %c0_i32_0 : i32
    scf.if %2 {
      %cst_18 = arith.constant 0.000000e+00 : f32
      %37 = vector.broadcast %cst_18 : f32 to vector<8x1xf32>
      %c0_19 = arith.constant 0 : index
      %c0_20 = arith.constant 0 : index
      %38 = vector.load %arg7[%c0_19, %c0_20] : memref<8x1xf32, #tpu.memory_space<vmem>>, vector<8x1xf32>
      tpu.vector_store %arg7[%c0_19, %c0_20], %37 {strides = array<i32>} : memref<8x1xf32, #tpu.memory_space<vmem>>, vector<8x1xf32>,
    } else {
    }
    %c0 = arith.constant 0 : index
    %c0_1 = arith.constant 0 : index
    %3 = vector.load %arg2[%c0, %c0_1] : memref<8x128xf32, #tpu.memory_space<vmem>>, vector<8x128xf32>
    %4 = arith.mulf %3, %3 : vector<8x128xf32>
    %cst = arith.constant dense<0.000000e+00> : vector<8xf32>
    %5 = vector.multi_reduction <add>, %4, %cst [1] : vector<8x128xf32> to vector<8xf32>
    %6 = vector.shape_cast %5 : vector<8xf32> to vector<8x1xf32>
    %cst_2 = arith.constant 1.000000e-16 : f32
    %7 = vector.broadcast %cst_2 : f32 to vector<8x1xf32>
    %8 = arith.maximumf %6, %7 : vector<8x1xf32>
    %9 = math.rsqrt %8 : vector<8x1xf32>
    %cst_3 = arith.constant 1.41421354 : f32
    %10 = vector.broadcast %cst_3 : f32 to vector<8x1xf32>
    %11 = arith.mulf %9, %10 : vector<8x1xf32>
    %12 = vector.broadcast %11 : vector<8x1xf32> to vector<8x128xf32>
    %13 = arith.mulf %3, %12 : vector<8x128xf32>
    %c0_4 = arith.constant 0 : index
    %c0_5 = arith.constant 0 : index
    %14 = vector.load %arg3[%c0_4, %c0_5] : memref<8x128xf32, #tpu.memory_space<vmem>>, vector<8x128xf32>
    %15 = arith.mulf %14, %14 : vector<8x128xf32>
    %cst_6 = arith.constant dense<0.000000e+00> : vector<8xf32>
    %16 = vector.multi_reduction <add>, %15, %cst_6 [1] : vector<8x128xf32> to vector<8xf32>
    %17 = vector.shape_cast %16 : vector<8xf32> to vector<8x1xf32>
    %cst_7 = arith.constant 1.000000e-16 : f32
    %18 = vector.broadcast %cst_7 : f32 to vector<8x1xf32>
    %19 = arith.maximumf %17, %18 : vector<8x1xf32>
    %20 = math.rsqrt %19 : vector<8x1xf32>
    %cst_8 = arith.constant 1.41421354 : f32
    %21 = vector.broadcast %cst_8 : f32 to vector<8x1xf32>
    %22 = arith.mulf %20, %21 : vector<8x1xf32>
    %23 = vector.broadcast %22 : vector<8x1xf32> to vector<8x128xf32>
    %24 = arith.mulf %14, %23 : vector<8x128xf32>
    %cst_9 = arith.constant dense<0.000000e+00> : vector<8x8xf32>
    %25 = tpu.matmul %13, %24, %cst_9 {dimension_numbers = #tpu.dot_dimension_numbers<[1], [1], [0], [0], [0, 0, 1, 0], [], []>} : vector<8x128xf32>, vector<8x128xf32>, vector<8x8xf32> -> vector<8x8xf32>
    %c0_10 = arith.constant 0 : index
    %c0_11 = arith.constant 0 : index
    %26 = vector.load %arg7[%c0_10, %c0_11] : memref<8x1xf32, #tpu.memory_space<vmem>>, vector<8x1xf32>
    %cst_12 = arith.constant 2.000000e+00 : f32
    %27 = vector.broadcast %cst_12 : f32 to vector<8x8xf32>
    %28 = arith.subf %25, %27 : vector<8x8xf32>
    %29 = math.exp %28 : vector<8x8xf32>
    %cst_13 = arith.constant dense<0.000000e+00> : vector<8xf32>
    %30 = vector.multi_reduction <add>, %29, %cst_13 [1] : vector<8x8xf32> to vector<8xf32>
    %31 = vector.shape_cast %30 : vector<8xf32> to vector<8x1xf32>
    %32 = arith.addf %26, %31 : vector<8x1xf32>
    %c0_14 = arith.constant 0 : index
    %c0_15 = arith.constant 0 : index
    %33 = vector.load %arg7[%c0_14, %c0_15] : memref<8x1xf32, #tpu.memory_space<vmem>>, vector<8x1xf32>
    tpu.vector_store %arg7[%c0_14, %c0_15], %32 {strides = array<i32>} : memref<8x1xf32, #tpu.memory_space<vmem>>, vector<8x1xf32>,
    %c0_i32_16 = arith.constant 0 : i32
    %34 = arith.cmpi eq, %arg1, %c0_i32_16 : i32
    %35 = arith.extui %34 : i1 to i32
    %c0_i32_17 = arith.constant 0 : i32
    %36 = arith.cmpi ne, %35, %c0_i32_17 : i32
    scf.if %36 {
      %c0_18 = arith.constant 0 : index
      %c0_19 = arith.constant 0 : index
      %37 = vector.load %arg4[%c0_18, %c0_19] : memref<4x128xf32, #tpu.memory_space<vmem>>, vector<4x128xf32>
      %38 = arith.mulf %37, %37 : vector<4x128xf32>
      %cst_20 = arith.constant dense<0.000000e+00> : vector<4xf32>
      %39 = vector.multi_reduction <add>, %38, %cst_20 [1] : vector<4x128xf32> to vector<4xf32>
      %40 = vector.shape_cast %39 : vector<4xf32> to vector<4x1xf32>
      %cst_21 = arith.constant 1.000000e-16 : f32
      %41 = vector.broadcast %cst_21 : f32 to vector<4x1xf32>
      %42 = arith.maximumf %40, %41 : vector<4x1xf32>
      %43 = math.rsqrt %42 : vector<4x1xf32>
      %cst_22 = arith.constant 1.41421354 : f32
      %44 = vector.broadcast %cst_22 : f32 to vector<4x1xf32>
      %45 = arith.mulf %43, %44 : vector<4x1xf32>
      %46 = vector.broadcast %45 : vector<4x1xf32> to vector<4x128xf32>
      %47 = arith.mulf %37, %46 : vector<4x128xf32>
      %c0_23 = arith.constant 0 : index
      %c0_24 = arith.constant 0 : index
      %48 = vector.load %arg5[%c0_23, %c0_24] : memref<4x128xf32, #tpu.memory_space<vmem>>, vector<4x128xf32>
      %49 = arith.mulf %48, %48 : vector<4x128xf32>
      %cst_25 = arith.constant dense<0.000000e+00> : vector<4xf32>
      %50 = vector.multi_reduction <add>, %49, %cst_25 [1] : vector<4x128xf32> to vector<4xf32>
      %51 = vector.shape_cast %50 : vector<4xf32> to vector<4x1xf32>
      %cst_26 = arith.constant 1.000000e-16 : f32
      %52 = vector.broadcast %cst_26 : f32 to vector<4x1xf32>
      %53 = arith.maximumf %51, %52 : vector<4x1xf32>
      %54 = math.rsqrt %53 : vector<4x1xf32>
      %cst_27 = arith.constant 1.41421354 : f32
      %55 = vector.broadcast %cst_27 : f32 to vector<4x1xf32>
      %56 = arith.mulf %54, %55 : vector<4x1xf32>
      %57 = vector.broadcast %56 : vector<4x1xf32> to vector<4x128xf32>
      %58 = arith.mulf %48, %57 : vector<4x128xf32>
      %59 = arith.mulf %47, %58 : vector<4x128xf32>
      %cst_28 = arith.constant dense<0.000000e+00> : vector<4xf32>
      %60 = vector.multi_reduction <add>, %59, %cst_28 [1] : vector<4x128xf32> to vector<4xf32>
      %61 = vector.shape_cast %60 : vector<4xf32> to vector<4x1xf32>
      %c0_29 = arith.constant 0 : index
      %c0_30 = arith.constant 0 : index
      %62 = vector.load %arg7[%c0_29, %c0_30] : memref<8x1xf32, #tpu.memory_space<vmem>>, vector<8x1xf32>
      %cst_31 = arith.constant 0.135335281 : f32
      %63 = vector.broadcast %cst_31 : f32 to vector<8x1xf32>
      %64 = arith.subf %62, %63 : vector<8x1xf32>
      %65 = math.log %64 : vector<8x1xf32>
      %cst_32 = arith.constant 2.000000e+00 : f32
      %66 = vector.broadcast %cst_32 : f32 to vector<8x1xf32>
      %67 = arith.addf %66, %65 : vector<8x1xf32>
      %68 = vector.shape_cast %67 : vector<8x1xf32> to vector<1x8x1xf32>
      %cst_33 = arith.constant dense<0.000000e+00> : vector<1xf32>
      %69 = vector.multi_reduction <add>, %68, %cst_33 [1, 2] : vector<1x8x1xf32> to vector<1xf32>
      %70 = vector.shape_cast %69 : vector<1xf32> to vector<1x1x1xf32>
      %71 = vector.extract %70[0, 0, 0] : f32 from vector<1x1x1xf32>
      %72 = vector.shape_cast %61 : vector<4x1xf32> to vector<1x4x1xf32>
      %cst_34 = arith.constant dense<0.000000e+00> : vector<1xf32>
      %73 = vector.multi_reduction <add>, %72, %cst_34 [1, 2] : vector<1x4x1xf32> to vector<1xf32>
      %74 = vector.shape_cast %73 : vector<1xf32> to vector<1x1x1xf32>
      %75 = vector.extract %74[0, 0, 0] : f32 from vector<1x1x1xf32>
      %cst_35 = arith.constant 2.000000e+00 : f32
      %76 = arith.mulf %cst_35, %75 : f32
      %77 = arith.subf %71, %76 : f32
      %78 = vector.broadcast %77 : f32 to vector<8x128xf32>
      %c0_36 = arith.constant 0 : index
      %c0_37 = arith.constant 0 : index
      %79 = vector.load %arg6[%c0_36, %c0_37] : memref<8x128xf32, #tpu.memory_space<vmem>>, vector<8x128xf32>
      tpu.vector_store %arg6[%c0_36, %c0_37], %78 {strides = array<i32>} : memref<8x128xf32, #tpu.memory_space<vmem>>, vector<8x128xf32>,
    } else {
    }
    return
  }
  func.func @transform_0(%arg0: i32, %arg1: i32) -> (i32, i32) {
    %c0_i32 = arith.constant 0 : i32
    %c0_i32_0 = arith.constant 0 : i32
    return %arg0, %c0_i32 : i32, i32
  }
  func.func @transform_1(%arg0: i32, %arg1: i32) -> (i32, i32) {
    %c0_i32 = arith.constant 0 : i32
    %c0_i32_0 = arith.constant 0 : i32
    return %arg1, %c0_i32 : i32, i32
  }
  func.func @transform_2(%arg0: i32, %arg1: i32) -> (i32, i32) {
    %c0_i32 = arith.constant 0 : i32
    %c0_i32_0 = arith.constant 0 : i32
    %c0_i32_1 = arith.constant 0 : i32
    return %c0_i32, %c0_i32_0 : i32, i32
  }
  func.func @transform_3(%arg0: i32, %arg1: i32) -> (i32, i32) {
    %c0_i32 = arith.constant 0 : i32
    %c0_i32_0 = arith.constant 0 : i32
    %c0_i32_1 = arith.constant 0 : i32
    return %c0_i32, %c0_i32_0 : i32, i32
  }
  func.func @transform_4(%arg0: i32, %arg1: i32) -> (i32, i32) {
    %c0_i32 = arith.constant 0 : i32
    %c0_i32_0 = arith.constant 0 : i32
    return %arg0, %c0_i32 : i32, i32
  }
}

</mosaic_0001>

<bundles_post_ra>
// kernel: tpu_custom_call.1
= control target key start
LH: loop header
LB: loop body
LE: loop exit
PB: predicated region body
PF: predicated region fallthrough
CT: control target
= control target key end

     0   :  { %9 = vsyncpa [#allocation4], 0  ;;  %s397_s0 = inlined_call_operand.hbm [shape: f32[8,128], index: 0, kind: input, shape index: {}]   ;;  %s398_s1 = inlined_call_operand.hbm [shape: f32[8,128], index: 1, kind: input, shape index: {}]   ;;  %s399_s2 = inlined_call_operand.hbm [shape: f32[4,128], index: 2, kind: input, shape index: {}]   ;;  %s400_s3 = inlined_call_operand.vmem [shape: f32[4,128], index: 3, kind: input, shape index: {}]   ;;  %s401_s4 = inlined_call_operand.hbm [shape: f32[8,128], index: 4, kind: output, shape index: {}]  }
   0x1   :  { %10 = vsyncpa [#allocation7], 0 }
   0x2   :  { %11 = vsyncpa [#allocation5], 0  ;;  %s345_s15 = smov [#allocation6]   ;;  %s346_s17 = smov [#allocation3]  }
   0x3   :  { %s28_s16 = sshll.u32 %s345_s15, 4  ;;  %s18_s18 = sshll.u32 %s346_s17, 4  ;;  %s29_s16 = int_to_ptr.vmem [resolvable:$true] %s28_s16  ;;  %s19_s18 = int_to_ptr.vmem [resolvable:$true] %s18_s18 }
   0x4   :  { %s267_s19 = scalar_lea.vmem %s29_s16, 128  ;;  %p272_p1 = scmp.lt.s32.totalorder %s29_s16, %s29_s16 }
   0x5   :  { %p268_p0 = scmp.ne.s32.totalorder %s29_s16, %s267_s19  ;;  %p273_p2 = scmp.lt.s32.totalorder %s267_s19, %s267_s19 }
   0x7   :  { %p274_p3 = por %p273_p2, %p272_p1 }
   0x9   :  { %p275_p4 = pnand %p274_p3, %p268_p0 }
   0xb   :  { %278 = shalt.err (!%p275_p4)
}
   0xc   :  { %31 = dma.hbm_to_vmem [thread:$0]  %s398_s1, 128, %s29_s16, [#allocation7]  }
   0xd   :  { %s287_s22 = scalar_lea.vmem %s19_s18, 128  ;;  %p292_p6 = scmp.lt.s32.totalorder %s19_s18, %s19_s18 }
   0xe   :  { %p288_p5 = scmp.ne.s32.totalorder %s19_s18, %s287_s22  ;;  %p293_p7 = scmp.lt.s32.totalorder %s287_s22, %s287_s22 }
  0x10   :  { %p294_p8 = por %p293_p7, %p292_p6 }
  0x12   :  { %p295_p9 = pnand %p294_p8, %p288_p5 }
  0x14   :  { %298 = shalt.err (!%p295_p9)
}
  0x15   :  { %21 = dma.hbm_to_vmem [thread:$0]  %s397_s0, 128, %s19_s18, [#allocation4]  }
  0x16   :  { %s347_s25 = smov [#allocation8]  }
  0x17   :  { %s38_s26 = sshll.u32 %s347_s25, 4  ;;  %s39_s26 = int_to_ptr.vmem [resolvable:$true] %s38_s26 }
  0x18   :  { %s307_s27 = scalar_lea.vmem %s39_s26, 64  ;;  %p312_p11 = scmp.lt.s32.totalorder %s39_s26, %s39_s26 }
  0x19   :  { %p308_p10 = scmp.ne.s32.totalorder %s39_s26, %s307_s27  ;;  %p313_p12 = scmp.lt.s32.totalorder %s307_s27, %s307_s27 }
  0x1b   :  { %p314_p13 = por %p313_p12, %p312_p11 }
  0x1d   :  { %p315_p0 = pnand %p314_p13, %p308_p10 }
  0x1f   :  { %318 = shalt.err (!%p315_p0)
}
  0x20   :  { %41 = dma.hbm_to_vmem [thread:$0]  %s399_s2, 64, %s39_s26, [#allocation7]  }
  0x21   :  { %339 = dma.done.wait [#allocation4], 128  }
  0x22   :  { %340 = vsyncadd [#allocation4], 4294967168 }
  0x23   :  { %341 = dma.done.wait [#allocation7], 192  }
  0x24   :  { %342 = vsyncadd [#allocation7], 4294967104  ;;  %v67_v0 = vld [vmem:[#allocation6] sm:$0xff]  ;;  %v59_v1 = vld [vmem:[#allocation3] sm:$0xff]  ;;  %v348_v4 = vmov 0.0   ;;  %vm349_vm0 = vmmov 0  }
  0x25   :  { %v68_v2 = vmul.f32 %v67_v0, %v67_v0  ;;  %v60_v3 = vmul.f32 %v59_v1, %v59_v1  ;;  %232 = vmatprep.subr.mxu0 %v348_v4  ;;  %234 = vmatprep.mubr.msk.f32.mxu0 %vm349_vm0, %v348_v4  ;;  %v159_v5 = vld [vmem:[#allocation8] sm:$0xf]  ;;  %vm161_vm1 = vcmask 1043456   ;;  %v169_v6 = vld [vmem:[%s400_s3] sm:$0xf]  ;;  %vm57_vm2 = vcmask 7168  }
  0x26   :  { %v160_v7 = vmul.f32 %v159_v5, %v159_v5  ;;  %v170_v8 = vmul.f32 %v169_v6, %v169_v6  ;;  %58 = vst.msk [vmem:[#allocation2] sm:$0xff] %vm57_vm2, %v348_v4  ;;  %vm149_vm3 = vcmask 64512   ;;  %vm197_vm4 = vcmask 3072   ;;  %s350_s5 = smov [#allocation9]  }
  0x27   :  { %69 = vadd.xlane.f32.xlu0 %v68_v2  ;;  %s218_s6 = sshll.u32 %s350_s5, 4  ;;  %s219_s6 = int_to_ptr.vmem [resolvable:$true] %s218_s6 }
  0x28   :  { %v162_v9 = vsel %vm161_vm1, %v160_v7, 0.0  ;;  %v171_v10 = vsel %vm161_vm1, %v170_v8, 0.0  ;;  %s319_s8 = scalar_lea.vmem %s219_s6, 128  ;;  %p324_p2 = scmp.lt.s32.totalorder %s219_s6, %s219_s6 }
  0x29   :  { %163 = vadd.xlane.f32.xlu1 %v162_v9  ;;  %p320_p1 = scmp.ne.s32.totalorder %s219_s6, %s319_s8  ;;  %p325_p3 = scmp.lt.s32.totalorder %s319_s8, %s319_s8 }
  0x2b   :  { %61 = vadd.xlane.f32.xlu0 %v60_v3  ;;  %p326_p4 = por %p325_p3, %p324_p2 }
  0x2d   :  { %172 = vadd.xlane.f32.xlu1 %v171_v10  ;;  %v145_v41 = vld [vmem:[#allocation2] sm:$0xff]  ;;  %p327_p5 = pnand %p326_p4, %p320_p1 }
  0xb0   :  { %v70_v11 = vpop.xlane.xlu0 %69 }
  0xb1   :  { %v71_v12 = vmax.f32 %v70_v11, 1e-16 }
  0xb2   :  { %v164_v21 = vpop.xlane.xlu1 %163 }
  0xb3   :  { %247 = vrsqrt.f32 %v71_v12  ;;  %v165_v22 = vmax.f32 %v164_v21, 1e-16 }
  0xb4   :  { %v62_v13 = vpop.xlane.xlu0 %61 }
  0xb5   :  { %v63_v14 = vmax.f32 %v62_v13, 1e-16 }
  0xb6   :  { %v173_v23 = vpop.xlane.xlu1 %172 }
  0xb7   :  { %249 = vrsqrt.f32 %v63_v14  ;;  %v174_v24 = vmax.f32 %v173_v23, 1e-16 }
  0xb8   :  { %251 = vrsqrt.f32 %v165_v22 }
  0xb9   :  { %253 = vrsqrt.f32 %v174_v24 }
  0xc0   :  { %v248_v15 = vpop.eup %247 }
  0xc1   :  { %v73_v16 = vmul.f32 1.4142135, %v248_v15 }
  0xc3   :  { %v74_v17 = vmul.f32 %v73_v16, %v67_v0 }
  0xc4   :  { %v250_v18 = vpop.eup %249 }
  0xc5   :  { %v65_v19 = vmul.f32 1.4142135, %v250_v18  ;;  %233 = vmatpush3.xpose.msra.mxu0 %v74_v17  ;;  %v252_v25 = vpop.eup %251 }
  0xc6   :  { %v167_v26 = vmul.f32 1.4142135, %v252_v25  ;;  %v254_v27 = vpop.eup %253 }
  0xc7   :  { %v66_v20 = vmul.f32 %v65_v19, %v59_v1  ;;  %v176_v28 = vmul.f32 1.4142135, %v254_v27 }
  0xc8   :  { %v168_v29 = vmul.f32 %v167_v26, %v159_v5 }
  0xc9   :  { %235 = vmatmul.mubr.f32.vlgmr.msra.gmra.mxu0 %v66_v20  ;;  %v177_v30 = vmul.f32 %v176_v28, %v169_v6 }
  0xcb   :  { %v178_v31 = vmul.f32 %v177_v30, %v168_v29 }
  0xcd   :  { %v179_v32 = vsel %vm161_vm1, %v178_v31, 0.0 }
  0xce   :  { %180 = vadd.xlane.f32.xlu1 %v179_v32 }
 0x157   :  { %v181_v39 = vpop.xlane.xlu1 %180 }
 0x158   :  { %v198_v40 = vsel %vm197_vm4, %v181_v39, 0.0 }
 0x159   :  { %199 = vadd.xlane.f32.xlu1 %v198_v40 }
 0x189   :  { %v141_v33 = vpop.f32.mrf.mxu0 }
 0x18a   :  { %v228_v34 = vadd.f32 -2.0, %v141_v33 }
 0x18b   :  { %v236_v35 = vpop.f32.mrf.mxu0 }
 0x18c   :  { %v147_v36 = vmul.f32 1.442695, %v228_v34 }
 0x18e   :  { %255 = vpow2.f32 %v147_v36 }
 0x19b   :  { %v256_v37 = vpop.eup %255 }
 0x19c   :  { %v150_v38 = vsel %vm149_vm3, %v256_v37, 0.0 }
 0x19d   :  { %151 = vadd.xlane.f32.xlu0 %v150_v38 }
 0x1e2   :  { %v200_v50 = vpop.xlane.xlu1 %199 }
 0x1e3   :  { %v201_v51 = vrot.slane %v200_v50, 4 }
 0x1e5   :  { %v202_v52 = vadd.f32 %v201_v51, %v200_v50 }
 0x1e7   :  { %v203_v53 = vrot.slane %v202_v52, 2 }
 0x1e9   :  { %v204_v57 = vadd.f32 %v203_v53, %v202_v52 }
 0x1eb   :  { %v205_v60 = vrot.slane %v204_v57, 1 }
 0x1ed   :  { %v206_v63 = vadd.f32 %v205_v60, %v204_v57 }
 0x226   :  { %v152_v42 = vpop.xlane.xlu0 %151 }
 0x227   :  { %v153_v43 = vadd.f32 %v152_v42, %v145_v41 }
 0x229   :  { %155 = vst.msk [vmem:[#allocation2] sm:$0xff] %vm57_vm2, %v153_v43 }
 0x230   :  { %v182_v44 = vld [vmem:[#allocation2] sm:$0xff] }
 0x231   :  { %v229_v45 = vadd.f32 -0.13533528, %v182_v44 }
 0x233   :  { %257 = vlog2.f32 %v229_v45 }
 0x240   :  { %v258_v46 = vpop.eup %257 }
 0x241   :  { %v185_v47 = vmul.f32 0.6931472, %v258_v46 }
 0x243   :  { %v186_v48 = vadd.f32 2.0, %v185_v47 }
 0x245   :  { %v187_v49 = vsel %vm57_vm2, %v186_v48, 0.0 }
 0x246   :  { %188 = vadd.xlane.f32.xlu0 %v187_v49 }
 0x2cf   :  { %v189_v54 = vpop.xlane.xlu0 %188 }
 0x2d0   :  { %v190_v55 = vrot.slane %v189_v54, 4 }
 0x2d2   :  { %v191_v56 = vadd.f32 %v190_v55, %v189_v54 }
 0x2d4   :  { %v192_v58 = vrot.slane %v191_v56, 2 }
 0x2d6   :  { %v193_v59 = vadd.f32 %v192_v58, %v191_v56 }
 0x2d8   :  { %v194_v61 = vrot.slane %v193_v59, 1 }
 0x2da   :  { %v195_v62 = vadd.f32 %v194_v61, %v193_v59 }
 0x2dc   :  { %237 = vpush %v195_v62 }
 0x2dd   :  { %239 = vpush %v206_v63 }
 0x30d   :  { %s238_s2 = spop %237 }
 0x30e   :  { %s240_s3 = spop %239 }
 0x30f   :  { %s208_s30 = smul.f32 2.0, %s240_s3 }
 0x311   :  { %s209_s7 = ssub.f32 %s238_s2, %s208_s30 }
 0x313   :  { %v210_v0 = vstv %s209_s7 }
 0x314   :  { %211 = vst [vmem:[#allocation9] sm:$0xff] %v210_v0 }
 0x315   :  { %330 = shalt.err (!%p327_p5)
}
 0x316   :  { %221 = dma.vmem_to_hbm [thread:$0]  %s219_s6, 128, %s401_s4, [#allocation5]  }
 0x317   :  { %343 = dma.done.wait [#allocation5], 128  }
 0x318   :  { %344 = vsyncadd [#allocation5], 4294967168 }
 0x319   :  { %225 = vsyncpa [#allocation4], 1 }
 0x31a   :  { %226 = vsyncpa [#allocation7], 1 }
 0x31b   :  { %227 = vsyncpa [#allocation5], 1 }

</bundles_post_ra>
